<compile_context>
chip_gen: v5e
topology: v5e:2x2
jax: 0.10.0
libtpu: 0.0.40
codegen_flags: <defaults>
</compile_context>

<pallas_src>
import itertools
import math

import numpy as np
import jax
import jax.numpy as jnp
from jax.experimental import pallas as pl
from jax.experimental.pallas import tpu as pltpu


# ----------------------------------------------------------------------------
# Clifford algebra Cl(0,1,1,1) (projective geometric algebra) tables (numpy).
# Blade ordering: grade-then-lex:
#   0: 1 | 1-4: e0,e1,e2,e3 | 5-10: e01,e02,e03,e12,e13,e23 | 11-14: trivecs | 15: e0123
# ----------------------------------------------------------------------------
METRIC = (0.0, 1.0, 1.0, 1.0)
# even sub-algebra of PGA (rotations + translations): scalar, bivectors, pseudoscalar
ACTION_BLADES = np.array([0, 5, 6, 7, 8, 9, 10, 15])


def _blade_geometric_product(a, b, metric):
    elems = list(a) + list(b)
    sign = 1.0
    for i in range(1, len(elems)):                    # insertion sort, count swaps
        j = i
        while j > 0 and elems[j - 1] > elems[j]:
            elems[j - 1], elems[j] = elems[j], elems[j - 1]
            sign = -sign
            j -= 1
    out, k = [], 0
    while k < len(elems):                             # contract repeated generators
        if k + 1 < len(elems) and elems[k] == elems[k + 1]:
            sign *= metric[elems[k]]
            k += 2
        else:
            out.append(elems[k])
            k += 1
    return sign, tuple(out)


def build_algebra_tables():
    n = len(METRIC)
    blades = [()]
    for g in range(1, n + 1):
        blades += list(itertools.combinations(range(n), g))
    index = {b: i for i, b in enumerate(blades)}
    dim = len(blades)
    # cayley[i, j, k]:  (a b)_j = sum_{i,k} a_i * cayley[i, j, k] * b_k
    cayley = np.zeros((dim, dim, dim), dtype=np.float32)
    for i, a in enumerate(blades):
        for k, b in enumerate(blades):
            sign, res = _blade_geometric_product(a, b, METRIC)
            if sign != 0.0:
                cayley[i, index[res], k] += sign
    rev = np.array([(-1.0) ** (len(b) * (len(b) - 1) // 2) for b in blades],
                   dtype=np.float32)                   # reverse (~x) signs per blade
    return cayley, rev


def _round_up(x, m):
    return ((x + m - 1) // m) * m


# ----------------------------------------------------------------------------
# Deterministic parameter initialisation (shapes follow the PyTorch module)
# ----------------------------------------------------------------------------
def init_pga_linear_params(key, c_in, c_out):
    """PGAConjugateLinear params: _action (c_out, c_in, 8), weight (c_out, c_in)."""
    k_rot, k_w = jax.random.split(key)
    # rotation part (scalar, e12, e13, e23) ~ random unit rotor; translations zero,
    # matching the reference reset_parameters (unit-norm action).
    rot = jax.random.normal(k_rot, (c_out, c_in, 4), dtype=jnp.float32)
    rot = rot / jnp.linalg.norm(rot, axis=-1, keepdims=True)
    action8 = jnp.zeros((c_out, c_in, 8), dtype=jnp.float32)
    action8 = action8.at[..., 0].set(rot[..., 0])          # scalar
    action8 = action8.at[..., 4:7].set(rot[..., 1:])       # e12, e13, e23
    bound = 1.0 / math.sqrt(c_in)
    weight = jax.random.uniform(k_w, (c_out, c_in), dtype=jnp.float32,
                                minval=-bound, maxval=bound)
    return action8, weight


def fold_pga_linear(action8, weight, cayley, rev):
    """Fold weight[o,i] * (k[o,i] x ~k[o,i]) into one (C_in*16, C_out*16) matrix.

    Reproduces y = einsum("oi,poqi,qori,bir->bop", weight, k_r, k_l, x).
    """
    c_out, c_in, _ = action8.shape
    k16 = jnp.zeros((c_out, c_in, 16), dtype=jnp.float32)
    k16 = k16.at[..., ACTION_BLADES].set(action8)           # algebra.embed
    k16_rev = k16 * rev                                      # algebra.reverse
    # get_clifford_left_kernel / get_clifford_right_kernel (flatten=False)
    k_l = jnp.einsum("ijk,pqi->jpkq", cayley, k16)           # (16, O, 16, I)
    k_r = jnp.einsum("ijk,pqk->jpiq", cayley, k16_rev)       # (16, O, 16, I)
    sandwich = jnp.einsum("poqi,qori->opir", k_r, k_l)       # (O, 16, I, 16)
    w_fold = weight[:, None, :, None] * sandwich             # (O, 16, I, 16)
    return w_fold.reshape(c_out * 16, c_in * 16).T           # (C_in*16, C_out*16)


def init_mv_act_params(key, channels):
    """MultiVectorAct (agg='linear'): grouped Conv1d(channels, channels, k=16, groups=channels)."""
    kw, kb = jax.random.split(key)
    bound = 1.0 / math.sqrt(16.0)
    conv_w = jax.random.uniform(kw, (channels, 16), dtype=jnp.float32,
                                minval=-bound, maxval=bound)
    conv_b = jax.random.uniform(kb, (channels, 1), dtype=jnp.float32,
                                minval=-bound, maxval=bound)
    return conv_w, conv_b


def build_gate_mats(conv_w, conv_b, c_pad, dtype):
    """Block-diagonal gather (C*16, Cp) / scatter (Cp, C*16) matrices + bias (1, Cp)
    so the MultiVectorAct gate runs on the flat lane-dense (B, C*16) layout."""
    c = conv_w.shape[0]
    eye = jnp.eye(c, c_pad, dtype=jnp.float32)                       # (C, Cp)
    g = (conv_w[:, :, None] * eye[:, None, :]).reshape(c * 16, c_pad)  # gather
    s = jnp.repeat(eye.T, 16, axis=1)                                # (Cp, C*16) scatter
    b = jnp.zeros((1, c_pad), jnp.float32).at[0, :c].set(conv_b.reshape(-1))
    return g.astype(dtype), s.astype(dtype), b


# ----------------------------------------------------------------------------
# GCAMLP: init
# ----------------------------------------------------------------------------
def init_gcamlp(key, in_shape, out_shape, hidden_channels, hidden_layers,
                compute_dtype=jnp.bfloat16):
    assert hidden_layers > 0
    cayley, rev = build_algebra_tables()
    cayley = jnp.asarray(cayley)
    rev = jnp.asarray(rev)
    c_in = int(np.prod(in_shape))
    c_out = int(np.prod(out_shape))
    lin_shapes = ([(c_in, hidden_channels)]
                  + [(hidden_channels, hidden_channels)] * (hidden_layers - 1)
                  + [(hidden_channels, c_out)])
    keys = jax.random.split(key, 2 * len(lin_shapes))

    n_out = c_out * 16
    n_pad = _round_up(n_out, 128)           # lane-dense final stores (pad, slice after)

    layers = []
    for idx, (ci, co) in enumerate(lin_shapes):
        action8, weight = init_pga_linear_params(keys[2 * idx], ci, co)
        w_fold = fold_pga_linear(action8, weight, cayley, rev)   # (ci*16, co*16) f32
        if idx == len(lin_shapes) - 1 and n_pad != n_out:
            w_fold = jnp.pad(w_fold, ((0, 0), (0, n_pad - n_out)))
        layer = {"w": w_fold.astype(compute_dtype)}              # fold in f32, cast once
        if idx > 0:  # every PGA linear except the first is preceded by MultiVectorAct
            conv_w, conv_b = init_mv_act_params(keys[2 * idx + 1], ci)
            c_pad = _round_up(ci, 128)
            g, s, b = build_gate_mats(conv_w, conv_b, c_pad, compute_dtype)
            layer.update(gate_g=g, gate_s=s, gate_b=b)
        layers.append(layer)

    return {"layers": layers, "in_shape": tuple(in_shape), "out_shape": tuple(out_shape),
            "n_out": n_out, "n_pad": n_pad, "compute_dtype": compute_dtype}


# ----------------------------------------------------------------------------
# Fused Pallas kernel: whole MLP per batch tile, everything stays in VMEM/vregs.
# ----------------------------------------------------------------------------
def _make_fused_kernel(has_act, compute_dtype):
    def kernel(x_ref, *refs):
        o_ref = refs[-1]
        param = refs[:-1]
        h = x_ref[...]                                    # (TB, C_in*16), compute_dtype
        p = 0
        for act in has_act:
            if act:
                g_ref, s_ref, b_ref = param[p], param[p + 1], param[p + 2]
                p += 3
                # MultiVectorAct (agg='linear'): per-channel blade reduction -> sigmoid gate
                logit = jnp.dot(h.astype(compute_dtype), g_ref[...],
                                preferred_element_type=jnp.float32) + b_ref[...]
                gate = jax.nn.sigmoid(logit)              # (TB, Cp), f32
                gate_full = jnp.dot(gate.astype(compute_dtype), s_ref[...],
                                    preferred_element_type=jnp.float32)
                h = h * gate_full                         # f32, lane-dense
            w_ref = param[p]
            p += 1
            # PGAConjugateLinear: single MXU matmul against the folded sandwich matrix
            h = jnp.dot(h.astype(compute_dtype), w_ref[...],
                        preferred_element_type=jnp.float32)
        o_ref[...] = h.astype(o_ref.dtype)
    return kernel


def gcamlp_forward(params, x):
    # x: (batch, *in_shape, 16)  ->  (batch, *out_shape, 16)   (flatten=True path)
    batch = x.shape[0]
    cd = params["compute_dtype"]
    n_out, n_pad = params["n_out"], params["n_pad"]
    layers = params["layers"]

    h = x.reshape(batch, -1).astype(cd)                   # lane-dense (B, C_in*16)
    k0 = h.shape[1]

    sub = 16 if jnp.dtype(cd).itemsize == 2 else 8        # sublane-aligned batch tile
    tb = min(512, _round_up(batch, sub))
    b_pad = _round_up(batch, tb)
    if b_pad != batch:
        h = jnp.pad(h, ((0, b_pad - batch), (0, 0)))

    inputs = [h]
    in_specs = [pl.BlockSpec((tb, k0), lambda i: (i, 0))]
    has_act = []
    flops = 0
    transcendentals = 0
    param_bytes = 0
    for layer in layers:
        act = "gate_g" in layer
        has_act.append(act)
        if act:
            for name in ("gate_g", "gate_s", "gate_b"):
                arr = layer[name]
                inputs.append(arr)
                # full-array block, constant index -> DMA'd once, stays VMEM-resident
                in_specs.append(pl.BlockSpec(arr.shape, lambda i: (0, 0)))
                param_bytes += arr.size * arr.dtype.itemsize
            kg, cg = layer["gate_g"].shape
            flops += 2 * 2 * b_pad * kg * cg              # gather + scatter matmuls
            transcendentals += b_pad * cg                 # sigmoid
        w = layer["w"]
        inputs.append(w)
        in_specs.append(pl.BlockSpec(w.shape, lambda i: (0, 0)))
        param_bytes += w.size * w.dtype.itemsize
        flops += 2 * b_pad * w.shape[0] * w.shape[1]

    bytes_accessed = (h.size * h.dtype.itemsize + param_bytes + b_pad * n_pad * 4)

    # VMEM budget: resident params + double-buffered x/out tiles + intermediate headroom.
    max_width = max([k0, n_pad] + [l["w"].shape[1] for l in layers])
    vmem_est = (param_bytes + 2 * tb * k0 * h.dtype.itemsize
                + 2 * tb * n_pad * 4 + 6 * tb * max_width * 4)
    # TODO(synk): for large hidden_channels the fully-fused weights-resident strategy
    # exceeds VMEM (esp. v7x's 64 MiB); add N/K tiling + accumulator scratch there.
    cp_kwargs = {"dimension_semantics": ("parallel",)}    # v7x: shard batch tiles over 2 TCs
    if vmem_est > (24 << 20):
        cp_kwargs["vmem_limit_bytes"] = int(min(vmem_est + (8 << 20), 96 << 20))

    y = pl.pallas_call(
        _make_fused_kernel(tuple(has_act), cd),
        out_shape=jax.ShapeDtypeStruct((b_pad, n_pad), jnp.float32),
        grid=(b_pad // tb,),
        in_specs=in_specs,
        out_specs=pl.BlockSpec((tb, n_pad), lambda i: (i, 0)),
        compiler_params=pltpu.CompilerParams(**cp_kwargs),
        cost_estimate=pl.CostEstimate(flops=int(flops),
                                      transcendentals=int(transcendentals),
                                      bytes_accessed=int(bytes_accessed)),
    )(*inputs)

    y = y[:batch, :n_out]                                 # drop batch / lane padding
    return y.reshape(batch, *params["out_shape"], 16)


# ----------------------------------------------------------------------------
# Pure-JAX reference with identical dtype choices (for correctness check)
# ----------------------------------------------------------------------------
def gcamlp_reference(params, x):
    batch = x.shape[0]
    cd = params["compute_dtype"]
    h = x.reshape(batch, -1).astype(cd).astype(jnp.float32)
    for layer in params["layers"]:
        if "gate_g" in layer:
            logit = jnp.dot(h.astype(cd), layer["gate_g"],
                            preferred_element_type=jnp.float32) + layer["gate_b"]
            gate = jax.nn.sigmoid(logit)
            h = h * jnp.dot(gate.astype(cd), layer["gate_s"],
                            preferred_element_type=jnp.float32)
        h = jnp.dot(h.astype(cd), layer["w"], preferred_element_type=jnp.float32)
    h = h[:, :params["n_out"]]
    return h.reshape(batch, *params["out_shape"], 16)


if __name__ == "__main__":
    key = jax.random.PRNGKey(0)
    k_param, k_x = jax.random.split(key)

    in_shape, out_shape = (2, 4), (4,)
    hidden_channels, hidden_layers = 8, 2

    params = init_gcamlp(k_param, in_shape, out_shape, hidden_channels, hidden_layers)
    x = jax.random.normal(k_x, (2, *in_shape, 16), dtype=jnp.float32)

    out = jax.block_until_ready(gcamlp_forward(params, x))
    ref = jax.block_until_ready(gcamlp_reference(params, x))

    assert out.shape == (2, *out_shape, 16), out.shape
    np.testing.assert_allclose(np.asarray(out), np.asarray(ref), rtol=1e-2, atol=1e-2)
    print("KERNEL_OK")
</pallas_src>

<mosaic_0001>
module attributes {stable_mosaic.version = 11 : i64} {
  func.func @kernel(%arg0: i32, %arg1: memref<16x128xbf16, #tpu.memory_space<vmem>>, %arg2: memref<128x128xbf16, #tpu.memory_space<vmem>>, %arg3: memref<128x128xbf16, #tpu.memory_space<vmem>>, %arg4: memref<128x128xbf16, #tpu.memory_space<vmem>>, %arg5: memref<1x128xf32, #tpu.memory_space<vmem>>, %arg6: memref<128x128xbf16, #tpu.memory_space<vmem>>, %arg7: memref<128x128xbf16, #tpu.memory_space<vmem>>, %arg8: memref<128x128xbf16, #tpu.memory_space<vmem>>, %arg9: memref<1x128xf32, #tpu.memory_space<vmem>>, %arg10: memref<128x128xbf16, #tpu.memory_space<vmem>>, %arg11: memref<16x128xf32, #tpu.memory_space<vmem>>) attributes {dimension_semantics = [#tpu.dimension_semantics<parallel>], iteration_bounds = array<i64: 1>, scalar_prefetch = 0 : i64, scratch_operands = 0 : i64, tpu.core_type = #tpu.core_type<tc>, window_params = [{transform_indices = @transform_0, window_bounds = array<i64: 16, 128>}, {pipeline_mode = #tpu.pipeline_mode<synchronous>, transform_indices = @transform_1, window_bounds = array<i64: 128, 128>}, {pipeline_mode = #tpu.pipeline_mode<synchronous>, transform_indices = @transform_2, window_bounds = array<i64: 128, 128>}, {pipeline_mode = #tpu.pipeline_mode<synchronous>, transform_indices = @transform_3, window_bounds = array<i64: 128, 128>}, {pipeline_mode = #tpu.pipeline_mode<synchronous>, transform_indices = @transform_4, window_bounds = array<i64: 1, 128>}, {pipeline_mode = #tpu.pipeline_mode<synchronous>, transform_indices = @transform_5, window_bounds = array<i64: 128, 128>}, {pipeline_mode = #tpu.pipeline_mode<synchronous>, transform_indices = @transform_6, window_bounds = array<i64: 128, 128>}, {pipeline_mode = #tpu.pipeline_mode<synchronous>, transform_indices = @transform_7, window_bounds = array<i64: 128, 128>}, {pipeline_mode = #tpu.pipeline_mode<synchronous>, transform_indices = @transform_8, window_bounds = array<i64: 1, 128>}, {pipeline_mode = #tpu.pipeline_mode<synchronous>, transform_indices = @transform_9, window_bounds = array<i64: 128, 128>}, {transform_indices = @transform_10, window_bounds = array<i64: 16, 128>}]} {
    %c0 = arith.constant 0 : index
    %c0_0 = arith.constant 0 : index
    %0 = vector.load %arg1[%c0, %c0_0] : memref<16x128xbf16, #tpu.memory_space<vmem>>, vector<16x128xbf16>
    %c0_1 = arith.constant 0 : index
    %c0_2 = arith.constant 0 : index
    %1 = vector.load %arg2[%c0_1, %c0_2] : memref<128x128xbf16, #tpu.memory_space<vmem>>, vector<128x128xbf16>
    %cst = arith.constant dense<0.000000e+00> : vector<16x128xf32>
    %2 = tpu.matmul %0, %1, %cst {dimension_numbers = #tpu.dot_dimension_numbers<[1], [0], [0], [1], [0, 0, 1, 1], [], []>} : vector<16x128xbf16>, vector<128x128xbf16>, vector<16x128xf32> -> vector<16x128xf32>
    %3 = arith.truncf %2 : vector<16x128xf32> to vector<16x128xbf16>
    %c0_3 = arith.constant 0 : index
    %c0_4 = arith.constant 0 : index
    %4 = vector.load %arg3[%c0_3, %c0_4] : memref<128x128xbf16, #tpu.memory_space<vmem>>, vector<128x128xbf16>
    %cst_5 = arith.constant dense<0.000000e+00> : vector<16x128xf32>
    %5 = tpu.matmul %3, %4, %cst_5 {dimension_numbers = #tpu.dot_dimension_numbers<[1], [0], [0], [1], [0, 0, 1, 1], [], []>} : vector<16x128xbf16>, vector<128x128xbf16>, vector<16x128xf32> -> vector<16x128xf32>
    %c0_6 = arith.constant 0 : index
    %c0_7 = arith.constant 0 : index
    %6 = vector.load %arg5[%c0_6, %c0_7] : memref<1x128xf32, #tpu.memory_space<vmem>>, vector<1x128xf32>
    %7 = vector.broadcast %6 : vector<1x128xf32> to vector<16x128xf32>
    %8 = arith.addf %5, %7 : vector<16x128xf32>
    %9 = arith.negf %8 : vector<16x128xf32>
    %10 = math.exp %9 : vector<16x128xf32>
    %cst_8 = arith.constant 1.000000e+00 : f32
    %11 = vector.broadcast %cst_8 : f32 to vector<16x128xf32>
    %12 = arith.addf %11, %10 : vector<16x128xf32>
    %13 = arith.divf %11, %12 : vector<16x128xf32>
    %14 = arith.truncf %13 : vector<16x128xf32> to vector<16x128xbf16>
    %c0_9 = arith.constant 0 : index
    %c0_10 = arith.constant 0 : index
    %15 = vector.load %arg4[%c0_9, %c0_10] : memref<128x128xbf16, #tpu.memory_space<vmem>>, vector<128x128xbf16>
    %cst_11 = arith.constant dense<0.000000e+00> : vector<16x128xf32>
    %16 = tpu.matmul %14, %15, %cst_11 {dimension_numbers = #tpu.dot_dimension_numbers<[1], [0], [0], [1], [0, 0, 1, 1], [], []>} : vector<16x128xbf16>, vector<128x128xbf16>, vector<16x128xf32> -> vector<16x128xf32>
    %17 = arith.mulf %2, %16 : vector<16x128xf32>
    %18 = arith.truncf %17 : vector<16x128xf32> to vector<16x128xbf16>
    %c0_12 = arith.constant 0 : index
    %c0_13 = arith.constant 0 : index
    %19 = vector.load %arg6[%c0_12, %c0_13] : memref<128x128xbf16, #tpu.memory_space<vmem>>, vector<128x128xbf16>
    %cst_14 = arith.constant dense<0.000000e+00> : vector<16x128xf32>
    %20 = tpu.matmul %18, %19, %cst_14 {dimension_numbers = #tpu.dot_dimension_numbers<[1], [0], [0], [1], [0, 0, 1, 1], [], []>} : vector<16x128xbf16>, vector<128x128xbf16>, vector<16x128xf32> -> vector<16x128xf32>
    %21 = arith.truncf %20 : vector<16x128xf32> to vector<16x128xbf16>
    %c0_15 = arith.constant 0 : index
    %c0_16 = arith.constant 0 : index
    %22 = vector.load %arg7[%c0_15, %c0_16] : memref<128x128xbf16, #tpu.memory_space<vmem>>, vector<128x128xbf16>
    %cst_17 = arith.constant dense<0.000000e+00> : vector<16x128xf32>
    %23 = tpu.matmul %21, %22, %cst_17 {dimension_numbers = #tpu.dot_dimension_numbers<[1], [0], [0], [1], [0, 0, 1, 1], [], []>} : vector<16x128xbf16>, vector<128x128xbf16>, vector<16x128xf32> -> vector<16x128xf32>
    %c0_18 = arith.constant 0 : index
    %c0_19 = arith.constant 0 : index
    %24 = vector.load %arg9[%c0_18, %c0_19] : memref<1x128xf32, #tpu.memory_space<vmem>>, vector<1x128xf32>
    %25 = vector.broadcast %24 : vector<1x128xf32> to vector<16x128xf32>
    %26 = arith.addf %23, %25 : vector<16x128xf32>
    %27 = arith.negf %26 : vector<16x128xf32>
    %28 = math.exp %27 : vector<16x128xf32>
    %cst_20 = arith.constant 1.000000e+00 : f32
    %29 = vector.broadcast %cst_20 : f32 to vector<16x128xf32>
    %30 = arith.addf %29, %28 : vector<16x128xf32>
    %31 = arith.divf %29, %30 : vector<16x128xf32>
    %32 = arith.truncf %31 : vector<16x128xf32> to vector<16x128xbf16>
    %c0_21 = arith.constant 0 : index
    %c0_22 = arith.constant 0 : index
    %33 = vector.load %arg8[%c0_21, %c0_22] : memref<128x128xbf16, #tpu.memory_space<vmem>>, vector<128x128xbf16>
    %cst_23 = arith.constant dense<0.000000e+00> : vector<16x128xf32>
    %34 = tpu.matmul %32, %33, %cst_23 {dimension_numbers = #tpu.dot_dimension_numbers<[1], [0], [0], [1], [0, 0, 1, 1], [], []>} : vector<16x128xbf16>, vector<128x128xbf16>, vector<16x128xf32> -> vector<16x128xf32>
    %35 = arith.mulf %20, %34 : vector<16x128xf32>
    %36 = arith.truncf %35 : vector<16x128xf32> to vector<16x128xbf16>
    %c0_24 = arith.constant 0 : index
    %c0_25 = arith.constant 0 : index
    %37 = vector.load %arg10[%c0_24, %c0_25] : memref<128x128xbf16, #tpu.memory_space<vmem>>, vector<128x128xbf16>
    %cst_26 = arith.constant dense<0.000000e+00> : vector<16x128xf32>
    %38 = tpu.matmul %36, %37, %cst_26 {dimension_numbers = #tpu.dot_dimension_numbers<[1], [0], [0], [1], [0, 0, 1, 1], [], []>} : vector<16x128xbf16>, vector<128x128xbf16>, vector<16x128xf32> -> vector<16x128xf32>
    %c0_27 = arith.constant 0 : index
    %c0_28 = arith.constant 0 : index
    %39 = vector.load %arg11[%c0_27, %c0_28] : memref<16x128xf32, #tpu.memory_space<vmem>>, vector<16x128xf32>
    tpu.vector_store %arg11[%c0_27, %c0_28], %38 {strides = array<i32>} : memref<16x128xf32, #tpu.memory_space<vmem>>, vector<16x128xf32>,
    return
  }
  func.func @transform_0(%arg0: i32) -> (i32, i32) {
    %c0_i32 = arith.constant 0 : i32
    %c0_i32_0 = arith.constant 0 : i32
    return %arg0, %c0_i32 : i32, i32
  }
  func.func @transform_1(%arg0: i32) -> (i32, i32) {
    %c0_i32 = arith.constant 0 : i32
    %c0_i32_0 = arith.constant 0 : i32
    %c0_i32_1 = arith.constant 0 : i32
    return %c0_i32, %c0_i32_0 : i32, i32
  }
  func.func @transform_2(%arg0: i32) -> (i32, i32) {
    %c0_i32 = arith.constant 0 : i32
    %c0_i32_0 = arith.constant 0 : i32
    %c0_i32_1 = arith.constant 0 : i32
    return %c0_i32, %c0_i32_0 : i32, i32
  }
  func.func @transform_3(%arg0: i32) -> (i32, i32) {
    %c0_i32 = arith.constant 0 : i32
    %c0_i32_0 = arith.constant 0 : i32
    %c0_i32_1 = arith.constant 0 : i32
    return %c0_i32, %c0_i32_0 : i32, i32
  }
  func.func @transform_4(%arg0: i32) -> (i32, i32) {
    %c0_i32 = arith.constant 0 : i32
    %c0_i32_0 = arith.constant 0 : i32
    %c0_i32_1 = arith.constant 0 : i32
    return %c0_i32, %c0_i32_0 : i32, i32
  }
  func.func @transform_5(%arg0: i32) -> (i32, i32) {
    %c0_i32 = arith.constant 0 : i32
    %c0_i32_0 = arith.constant 0 : i32
    %c0_i32_1 = arith.constant 0 : i32
    return %c0_i32, %c0_i32_0 : i32, i32
  }
  func.func @transform_6(%arg0: i32) -> (i32, i32) {
    %c0_i32 = arith.constant 0 : i32
    %c0_i32_0 = arith.constant 0 : i32
    %c0_i32_1 = arith.constant 0 : i32
    return %c0_i32, %c0_i32_0 : i32, i32
  }
  func.func @transform_7(%arg0: i32) -> (i32, i32) {
    %c0_i32 = arith.constant 0 : i32
    %c0_i32_0 = arith.constant 0 : i32
    %c0_i32_1 = arith.constant 0 : i32
    return %c0_i32, %c0_i32_0 : i32, i32
  }
  func.func @transform_8(%arg0: i32) -> (i32, i32) {
    %c0_i32 = arith.constant 0 : i32
    %c0_i32_0 = arith.constant 0 : i32
    %c0_i32_1 = arith.constant 0 : i32
    return %c0_i32, %c0_i32_0 : i32, i32
  }
  func.func @transform_9(%arg0: i32) -> (i32, i32) {
    %c0_i32 = arith.constant 0 : i32
    %c0_i32_0 = arith.constant 0 : i32
    %c0_i32_1 = arith.constant 0 : i32
    return %c0_i32, %c0_i32_0 : i32, i32
  }
  func.func @transform_10(%arg0: i32) -> (i32, i32) {
    %c0_i32 = arith.constant 0 : i32
    %c0_i32_0 = arith.constant 0 : i32
    return %arg0, %c0_i32 : i32, i32
  }
}

</mosaic_0001>

<bundles_post_ra>
// kernel: tpu_custom_call.1
= control target key start
LH: loop header
LB: loop body
LE: loop exit
PB: predicated region body
PF: predicated region fallthrough
CT: control target
= control target key end

     0   :  { %15 = vsyncpa [#allocation3], 0  ;;  %s1523_s0 = inlined_call_operand.hbm [shape: bf16[16,128], index: 0, kind: input, shape index: {}]   ;;  %s1524_s1 = inlined_call_operand.hbm [shape: bf16[128,128], index: 1, kind: input, shape index: {}]   ;;  %s1525_s2 = inlined_call_operand.hbm [shape: bf16[128,128], index: 2, kind: input, shape index: {}]   ;;  %s1526_s3 = inlined_call_operand.hbm [shape: bf16[128,128], index: 3, kind: input, shape index: {}]   ;;  %s1527_s4 = inlined_call_operand.vmem [shape: f32[1,128], index: 4, kind: input, shape index: {}]   ;;  %s1528_s5 = inlined_call_operand.hbm [shape: bf16[128,128], index: 5, kind: input, shape index: {}]   ;;  %s1529_s6 = inlined_call_operand.hbm [shape: bf16[128,128], index: 6, kind: input, shape index: {}]   ;;  %s1530_s7 = inlined_call_operand.hbm [shape: bf16[128,128], index: 7, kind: input, shape index: {}]   ;;  %s1531_s8 = inlined_call_operand.vmem [shape: f32[1,128], index: 8, kind: input, shape index: {}]   ;;  %s1532_s9 = inlined_call_operand.hbm [shape: bf16[128,128], index: 9, kind: input, shape index: {}]   ;;  %s1533_s10 = inlined_call_operand.hbm [shape: f32[16,128], index: 10, kind: output, shape index: {}]  }
   0x1   :  { %16 = vsyncpa [#allocation6], 0 }
   0x2   :  { %17 = vsyncpa [#allocation9], 0 }
   0x3   :  { %18 = vsyncpa [#allocation12], 0 }
   0x4   :  { %19 = vsyncpa [#allocation15], 0 }
   0x5   :  { %20 = vsyncpa [#allocation4], 0  ;;  %s38_s15 = sshll.u32 %s1524_s1, 4  ;;  %s1382_s16 = smov [#allocation5]   ;;  %s39_s15 = int_to_ptr.hbm [resolvable:$true] %s38_s15 }
   0x6   :  { %s40_s17 = sshll.u32 %s1382_s16, 4  ;;  %s64_s20 = sshll.u32 %s1526_s3, 4  ;;  %s41_s17 = int_to_ptr.vmem [resolvable:$true] %s40_s17  ;;  %s65_s20 = int_to_ptr.hbm [resolvable:$true] %s64_s20 }
   0x7   :  { %s1383_s21 = smov 64   ;;  %s1384_s22 = smov 4  }
   0x8   :  { %46 = dma.hbm_to_vmem [thread:$0]  %s39_s15, 1024, %s41_s17, [#allocation6], %s1383_s21, %s1383_s21, %s1384_s22  }
   0x9   :  { %s1385_s23 = smov [#allocation8]   ;;  %s92_s1 = sshll.u32 %s1529_s6, 4  ;;  %s93_s1 = int_to_ptr.hbm [resolvable:$true] %s92_s1 }
   0xa   :  { %s66_s24 = sshll.u32 %s1385_s23, 4  ;;  %s25_s28 = sshll.u32 %s1523_s0, 4  ;;  %s67_s24 = int_to_ptr.vmem [resolvable:$true] %s66_s24  ;;  %s26_s28 = int_to_ptr.hbm [resolvable:$true] %s25_s28 }
   0xb   :  { %72 = dma.hbm_to_vmem [thread:$0]  %s65_s20, 1024, %s67_s24, [#allocation9], %s1383_s21, %s1383_s21, %s1384_s22  }
   0xc   :  { %s1386_s29 = smov [#allocation11]   ;;  %s1387_s11 = smov [#allocation2]  }
   0xd   :  { %s94_s30 = sshll.u32 %s1386_s29, 4  ;;  %s27_s6 = sshll.u32 %s1387_s11, 4  ;;  %s95_s30 = int_to_ptr.vmem [resolvable:$true] %s94_s30  ;;  %s28_s6 = int_to_ptr.vmem [resolvable:$true] %s27_s6 }
   0xe   :  { %100 = dma.hbm_to_vmem [thread:$0]  %s93_s1, 1024, %s95_s30, [#allocation12], %s1383_s21, %s1383_s21, %s1384_s22  }
   0xf   :  { %s51_s14 = sshll.u32 %s1525_s2, 4  ;;  %s79_s16 = sshll.u32 %s1528_s5, 4  ;;  %s52_s14 = int_to_ptr.hbm [resolvable:$true] %s51_s14  ;;  %s80_s16 = int_to_ptr.hbm [resolvable:$true] %s79_s16 }
  0x10   :  { %33 = dma.hbm_to_vmem [thread:$0]  %s26_s28, 128, %s28_s6, [#allocation3], %s1383_s21, %s1383_s21, %s1384_s22  }
  0x11   :  { %s1388_s17 = smov [#allocation7]   ;;  %s1389_s19 = smov [#allocation10]  }
  0x12   :  { %s53_s18 = sshll.u32 %s1388_s17, 4  ;;  %s81_s2 = sshll.u32 %s1389_s19, 4  ;;  %s54_s18 = int_to_ptr.vmem [resolvable:$true] %s53_s18  ;;  %s82_s2 = int_to_ptr.vmem [resolvable:$true] %s81_s2 }
  0x13   :  { %59 = dma.hbm_to_vmem [thread:$0]  %s52_s14, 1024, %s54_s18, [#allocation6], %s1383_s21, %s1383_s21, %s1384_s22  }
  0x14   :  { %s105_s24 = sshll.u32 %s1530_s7, 4  ;;  %s120_s26 = sshll.u32 %s1532_s9, 4  ;;  %s106_s24 = int_to_ptr.hbm [resolvable:$true] %s105_s24  ;;  %s121_s26 = int_to_ptr.hbm [resolvable:$true] %s120_s26 }
  0x15   :  { %87 = dma.hbm_to_vmem [thread:$0]  %s80_s16, 1024, %s82_s2, [#allocation9], %s1383_s21, %s1383_s21, %s1384_s22  }
  0x16   :  { %s1390_s1 = smov [#allocation13]   ;;  %s1391_s27 = smov [#allocation14]  }
  0x17   :  { %s107_s3 = sshll.u32 %s1390_s1, 4  ;;  %s122_s7 = sshll.u32 %s1391_s27, 4  ;;  %s108_s3 = int_to_ptr.vmem [resolvable:$true] %s107_s3  ;;  %s123_s7 = int_to_ptr.vmem [resolvable:$true] %s122_s7 }
  0x18   :  { %113 = dma.hbm_to_vmem [thread:$0]  %s106_s24, 1024, %s108_s3, [#allocation12], %s1383_s21, %s1383_s21, %s1384_s22  }
  0x19   :  { %128 = dma.hbm_to_vmem [thread:$0]  %s121_s26, 1024, %s123_s7, [#allocation15], %s1383_s21, %s1383_s21, %s1384_s22  }
  0x1a   :  { %1370 = dma.done.wait [#allocation3], 128  }
  0x1b   :  { %1371 = vsyncadd [#allocation3], 4294967168 }
  0x1c   :  { %1372 = dma.done.wait [#allocation6], 2048  }
  0x1d   :  { %1373 = vsyncadd [#allocation6], 4294965248 }
  0x1e   :  { %1374 = dma.done.wait [#allocation9], 2048  }
  0x1f   :  { %1375 = vsyncadd [#allocation9], 4294965248 }
  0x20   :  { %1376 = dma.done.wait [#allocation12], 2048  }
  0x21   :  { %1377 = vsyncadd [#allocation12], 4294965248 }
  0x22   :  { %1378 = dma.done.wait [#allocation15], 1024  }
  0x23   :  { %1379 = vsyncadd [#allocation15], 4294966272  ;;  %v1074_v0 = vld [vmem:[#allocation5 + $0x38] sm:$0xff]  ;;  %v1073_v1 = vld [vmem:[#allocation5 + $0x30] sm:$0xff]  ;;  %s817_s11 = sshll.u32 %s1533_s10, 4  ;;  %s1393_s6 = smov 128   ;;  %s818_s11 = int_to_ptr.hbm [resolvable:$true] %s817_s11 }
  0x24   :  { %233 = vmatpush.bf16.msra.mxu0 %v1074_v0  ;;  %v1082_v2 = vld [vmem:[#allocation7 + $0x38] sm:$0xff]  ;;  %v1081_v3 = vld [vmem:[#allocation7 + $0x30] sm:$0xff]  ;;  %v1072_v4 = vld [vmem:[#allocation5 + $0x28] sm:$0xff]  ;;  %s1394_s12 = smov 8  }
  0x25   :  { %316 = vmatpush.bf16.msra.mxu1 %v1082_v2  ;;  %v1080_v5 = vld [vmem:[#allocation7 + $0x28] sm:$0xff]  ;;  %v1071_v6 = vld [vmem:[#allocation5 + $0x20] sm:$0xff]  ;;  %v1070_v8 = vld [vmem:[#allocation5 + $0x18] sm:$0xff] }
  0x26   :  { %v1079_v7 = vld [vmem:[#allocation7 + $0x20] sm:$0xff]  ;;  %v1078_v9 = vld [vmem:[#allocation7 + $0x18] sm:$0xff]  ;;  %v1069_v10 = vld [vmem:[#allocation5 + $0x10] sm:$0xff] }
  0x27   :  { %v1068_v11 = vld [vmem:[#allocation5 + $0x8] sm:$0xff]  ;;  %v1067_v12 = vld [vmem:[#allocation5] sm:$0xff]  ;;  %v1066_v13 = vld [vmem:[#allocation2] sm:$0xff] }
  0x28   :  { %234 = vmatpush.bf16.msra.mxu0 %v1073_v1  ;;  %v1077_v14 = vld [vmem:[#allocation7 + $0x10] sm:$0xff]  ;;  %v1076_v15 = vld [vmem:[#allocation7 + $0x8] sm:$0xff]  ;;  %v1075_v16 = vld [vmem:[#allocation7] sm:$0xff] }
  0x29   :  { %317 = vmatpush.bf16.msra.mxu1 %v1081_v3  ;;  %v1090_v20 = vld [vmem:[#allocation8 + $0x38] sm:$0xff]  ;;  %v1089_v21 = vld [vmem:[#allocation8 + $0x30] sm:$0xff]  ;;  %v1088_v22 = vld [vmem:[#allocation8 + $0x28] sm:$0xff] }
  0x2a   :  { %433 = vmatpush.bf16.msra.mxu2 %v1090_v20  ;;  %v1087_v23 = vld [vmem:[#allocation8 + $0x20] sm:$0xff]  ;;  %v1086_v24 = vld [vmem:[#allocation8 + $0x18] sm:$0xff]  ;;  %v1085_v25 = vld [vmem:[#allocation8 + $0x10] sm:$0xff] }
  0x2b   :  { %v1136_v26 = vld [vmem:[%s1527_s4] ss:$0 sm:$0xff]  ;;  %v1084_v27 = vld [vmem:[#allocation8 + $0x8] sm:$0xff]  ;;  %v1083_v30 = vld [vmem:[#allocation8] sm:$0xff] }
  0x2c   :  { %235 = vmatpush.bf16.msra.mxu0 %v1072_v4  ;;  %v1098_v34 = vld [vmem:[#allocation10 + $0x38] sm:$0xff]  ;;  %v1097_v37 = vld [vmem:[#allocation10 + $0x30] sm:$0xff]  ;;  %v1096_v39 = vld [vmem:[#allocation10 + $0x28] sm:$0xff] }
  0x2d   :  { %318 = vmatpush.bf16.msra.mxu1 %v1080_v5  ;;  %514 = vmatpush.bf16.msra.mxu3 %v1098_v34  ;;  %v1095_v41 = vld [vmem:[#allocation10 + $0x20] sm:$0xff]  ;;  %v1094_v46 = vld [vmem:[#allocation10 + $0x18] sm:$0xff]  ;;  %v1093_v1 = vld [vmem:[#allocation10 + $0x10] sm:$0xff] }
  0x2e   :  { %434 = vmatpush.bf16.msra.mxu2 %v1089_v21  ;;  %v1092_v2 = vld [vmem:[#allocation10 + $0x8] sm:$0xff]  ;;  %v1091_v3 = vld [vmem:[#allocation10] sm:$0xff]  ;;  %v1106_v4 = vld [vmem:[#allocation11 + $0x38] sm:$0xff] }
  0x2f   :  { %v1105_v5 = vld [vmem:[#allocation11 + $0x30] sm:$0xff]  ;;  %v1122_v34 = vld [vmem:[#allocation14 + $0x38] sm:$0xff] }
  0x30   :  { %236 = vmatpush.bf16.msra.mxu0 %v1071_v6  ;;  %v1104_v6 = vld [vmem:[#allocation11 + $0x28] sm:$0xff] }
  0x31   :  { %319 = vmatpush.bf16.msra.mxu1 %v1079_v7  ;;  %515 = vmatpush.bf16.msra.mxu3 %v1097_v37  ;;  %v1103_v7 = vld [vmem:[#allocation11 + $0x20] sm:$0xff]  ;;  %v1121_v37 = vld [vmem:[#allocation14 + $0x30] sm:$0xff] }
  0x32   :  { %435 = vmatpush.bf16.msra.mxu2 %v1088_v22  ;;  %v1114_v22 = vld [vmem:[#allocation13 + $0x38] sm:$0xff] }
  0x34   :  { %237 = vmatpush.bf16.msra.mxu0 %v1070_v8  ;;  %v1102_v8 = vld [vmem:[#allocation11 + $0x18] sm:$0xff] }
  0x35   :  { %320 = vmatpush.bf16.msra.mxu1 %v1078_v9  ;;  %516 = vmatpush.bf16.msra.mxu3 %v1096_v39  ;;  %v1120_v39 = vld [vmem:[#allocation14 + $0x28] sm:$0xff] }
  0x36   :  { %436 = vmatpush.bf16.msra.mxu2 %v1087_v23  ;;  %v1111_v23 = vld [vmem:[#allocation13 + $0x20] sm:$0xff] }
  0x38   :  { %238 = vmatpush.bf16.msra.mxu0 %v1069_v10 }
  0x39   :  { %321 = vmatpush.bf16.msra.mxu1 %v1077_v14  ;;  %517 = vmatpush.bf16.msra.mxu3 %v1095_v41  ;;  %v1101_v14 = vld [vmem:[#allocation11 + $0x10] sm:$0xff]  ;;  %v1119_v41 = vld [vmem:[#allocation14 + $0x20] sm:$0xff] }
  0x3a   :  { %437 = vmatpush.bf16.msra.mxu2 %v1086_v24  ;;  %v1110_v24 = vld [vmem:[#allocation13 + $0x18] sm:$0xff] }
  0x3c   :  { %239 = vmatpush.bf16.msra.mxu0 %v1068_v11 }
  0x3d   :  { %322 = vmatpush.bf16.msra.mxu1 %v1076_v15  ;;  %518 = vmatpush.bf16.msra.mxu3 %v1094_v46  ;;  %v1100_v15 = vld [vmem:[#allocation11 + $0x8] sm:$0xff]  ;;  %v1118_v46 = vld [vmem:[#allocation14 + $0x18] sm:$0xff] }
  0x3e   :  { %438 = vmatpush.bf16.msra.mxu2 %v1085_v25  ;;  %v1109_v25 = vld [vmem:[#allocation13 + $0x10] sm:$0xff] }
  0x40   :  { %240 = vmatpush.bf16.msra.mxu0 %v1067_v12 }
  0x41   :  { %323 = vmatpush.bf16.msra.mxu1 %v1075_v16  ;;  %519 = vmatpush.bf16.msra.mxu3 %v1093_v1  ;;  %v1099_v16 = vld [vmem:[#allocation11] sm:$0xff]  ;;  %v1117_v1 = vld [vmem:[#allocation14 + $0x10] sm:$0xff] }
  0x42   :  { %439 = vmatpush.bf16.msra.mxu2 %v1084_v27  ;;  %v1108_v27 = vld [vmem:[#allocation13 + $0x8] sm:$0xff] }
  0x43   :  { %241 = vmatmul.bf16.vlgmr.msra.gmra.mxu0 %v1066_v13 }
  0x44   :  { %597 = vmatpush.bf16.msrb.mxu0 %v1106_v4 }
  0x45   :  { %520 = vmatpush.bf16.msra.mxu3 %v1092_v2  ;;  %714 = vmatpush.bf16.msrb.mxu1 %v1114_v22  ;;  %v1116_v2 = vld [vmem:[#allocation14 + $0x8] sm:$0xff] }
  0x46   :  { %440 = vmatpush.bf16.msra.mxu2 %v1083_v30  ;;  %v1107_v30 = vld [vmem:[#allocation13] sm:$0xff] }
  0x48   :  { %598 = vmatpush.bf16.msrb.mxu0 %v1105_v5 }
  0x49   :  { %521 = vmatpush.bf16.msra.mxu3 %v1091_v3  ;;  %v1115_v3 = vld [vmem:[#allocation14] sm:$0xff] }
  0x4a   :  { %795 = vmatpush.bf16.msrb.mxu2 %v1122_v34 }
  0x4c   :  { %599 = vmatpush.bf16.msrb.mxu0 %v1104_v6 }
  0x4e   :  { %796 = vmatpush.bf16.msrb.mxu2 %v1121_v37 }
  0x50   :  { %600 = vmatpush.bf16.msrb.mxu0 %v1103_v7 }
  0x52   :  { %797 = vmatpush.bf16.msrb.mxu2 %v1120_v39 }
  0x54   :  { %601 = vmatpush.bf16.msrb.mxu0 %v1102_v8 }
  0x56   :  { %798 = vmatpush.bf16.msrb.mxu2 %v1119_v41 }
  0x58   :  { %602 = vmatpush.bf16.msrb.mxu0 %v1101_v14 }
  0x5a   :  { %799 = vmatpush.bf16.msrb.mxu2 %v1118_v46 }
  0x5c   :  { %603 = vmatpush.bf16.msrb.mxu0 %v1100_v15 }
  0x5e   :  { %800 = vmatpush.bf16.msrb.mxu2 %v1117_v1 }
  0x60   :  { %604 = vmatpush.bf16.msrb.mxu0 %v1099_v16 }
  0x62   :  { %801 = vmatpush.bf16.msrb.mxu2 %v1116_v2 }
  0x66   :  { %802 = vmatpush.bf16.msrb.mxu2 %v1115_v3 }
  0xc0   :  { %v1498_v17 = vpop.f32.mrf.mxu0 }
  0xc8   :  { %v1500_v18 = vpop.f32.mrf.mxu0 }
  0xc9   :  { %v247_v19 = vpack.c.bf16 %v1500_v18, %v1498_v17 }
  0xcb   :  { %324 = vmatmul.bf16.vlgmr.msra.gmra.mxu1 %v247_v19 }
 0x148   :  { %v325_v28 = vpop.f32.mrf.mxu1 }
 0x149   :  { %v326_v29 = vadd.f32 %v1136_v26, %v325_v28 }
 0x14b   :  { %v902_v31 = vmul.f32 -1.442695, %v326_v29 }
 0x14d   :  { %1138 = vpow2.f32 %v902_v31 }
 0x150   :  { %v327_v32 = vpop.f32.mrf.mxu1 }
 0x151   :  { %v328_v33 = vadd.f32 %v1136_v26, %v327_v32  ;;  %v1137_v26 = vld [vmem:[%s1531_s8] ss:$0 sm:$0xff]  ;;  %s1392_s8 = smov [#allocation16]  }
 0x152   :  { %s815_s28 = sshll.u32 %s1392_s8, 4  ;;  %s816_s28 = int_to_ptr.vmem [resolvable:$true] %s815_s28 }
 0x153   :  { %v1139_v35 = vpop.eup %1138  ;;  %v903_v36 = vmul.f32 -1.442695, %v328_v33 }
 0x154   :  { %v336_v38 = vadd.f32 1.0, %v1139_v35 }
 0x155   :  { %1140 = vpow2.f32 %v903_v36 }
 0x156   :  { %1142 = vrcp.f32 %v336_v38  ;;  %vm343_vm1 = vweird.f32 %v336_v38  ;;  %v349_v52 = vand.u32 2147483648, %v336_v38  ;;  %v347_v54 = vand.u32 2147483647, %v336_v38 }
 0x158   :  { %v350_v59 = vor.u32 1.1754944e-38, %v349_v52  ;;  %vm348_vm6 = vcmp.eq.f32.partialorder %v347_v54, 8.507059e+37 }
 0x15b   :  { %v1141_v40 = vpop.eup %1140 }
 0x15c   :  { %v1143_v42 = vpop.eup %1142  ;;  %v337_v43 = vadd.f32 1.0, %v1141_v40 }
 0x15d   :  { %v339_v44 = vmul.f32 %v1143_v42, %v336_v38  ;;  %vm344_vm0 = vweird.f32 %v1143_v42 }
 0x15e   :  { %1144 = vrcp.f32 %v337_v43  ;;  %v364_v53 = vand.u32 2147483648, %v337_v43  ;;  %v362_v56 = vand.u32 2147483647, %v337_v43  ;;  %vm345_vm3 = vmor %vm343_vm1, %vm344_vm0  ;;  %vm358_vm4 = vweird.f32 %v337_v43 }
 0x15f   :  { %v340_v45 = vsub.f32 1.0, %v339_v44 }
 0x160   :  { %v365_v60 = vor.u32 1.1754944e-38, %v364_v53  ;;  %vm363_vm7 = vcmp.eq.f32.partialorder %v362_v56, 8.507059e+37 }
 0x161   :  { %v341_v47 = vmul.f32 %v1143_v42, %v340_v45 }
 0x163   :  { %v342_v50 = vadd.f32 %v1143_v42, %v341_v47 }
 0x164   :  { %v1145_v48 = vpop.eup %1144 }
 0x165   :  { %v354_v49 = vmul.f32 %v1145_v48, %v337_v43  ;;  %vm359_vm2 = vweird.f32 %v1145_v48  ;;  %v346_v57 = vsel %vm345_vm3, %v1143_v42, %v342_v50 }
 0x166   :  { %vm360_vm5 = vmor %vm358_vm4, %vm359_vm2  ;;  %v351_v62 = vsel %vm348_vm6, %v350_v59, %v346_v57 }
 0x167   :  { %v355_v51 = vsub.f32 1.0, %v354_v49 }
 0x169   :  { %v356_v55 = vmul.f32 %v1145_v48, %v355_v51 }
 0x16b   :  { %v357_v58 = vadd.f32 %v1145_v48, %v356_v55 }
 0x16d   :  { %v361_v61 = vsel %vm360_vm5, %v1145_v48, %v357_v58 }
 0x16e   :  { %v366_v63 = vsel %vm363_vm7, %v365_v60, %v361_v61 }
 0x16f   :  { %v368_v0 = vpack.c.bf16 %v366_v63, %v351_v62 }
 0x171   :  { %441 = vmatmul.bf16.vlgmr.msra.gmra.mxu2 %v368_v0 }
 0x1f4   :  { %v442_v9 = vpop.f32.mrf.mxu2 }
 0x1f5   :  { %v447_v11 = vmul.f32 %v442_v9, %v1498_v17  ;;  %v1113_v17 = vld [vmem:[#allocation13 + $0x30] sm:$0xff] }
 0x1f6   :  { %715 = vmatpush.bf16.msrb.mxu1 %v1113_v17 }
 0x1fc   :  { %v444_v10 = vpop.f32.mrf.mxu2 }
 0x1fd   :  { %v448_v12 = vmul.f32 %v444_v10, %v1500_v18  ;;  %v1112_v18 = vld [vmem:[#allocation13 + $0x28] sm:$0xff] }
 0x1fe   :  { %716 = vmatpush.bf16.msrb.mxu1 %v1112_v18 }
 0x1ff   :  { %v449_v13 = vpack.c.bf16 %v448_v12, %v447_v11 }
 0x201   :  { %522 = vmatmul.bf16.vlgmr.msra.gmra.mxu3 %v449_v13 }
 0x202   :  { %717 = vmatpush.bf16.msrb.mxu1 %v1111_v23 }
 0x206   :  { %718 = vmatpush.bf16.msrb.mxu1 %v1110_v24 }
 0x20a   :  { %719 = vmatpush.bf16.msrb.mxu1 %v1109_v25 }
 0x20e   :  { %720 = vmatpush.bf16.msrb.mxu1 %v1108_v27 }
 0x212   :  { %721 = vmatpush.bf16.msrb.mxu1 %v1107_v30 }
 0x284   :  { %v1509_v19 = vpop.f32.mrf.mxu3 }
 0x28c   :  { %v1511_v20 = vpop.f32.mrf.mxu3 }
 0x28d   :  { %v528_v21 = vpack.c.bf16 %v1511_v20, %v1509_v19 }
 0x28f   :  { %605 = vmatmul.bf16.vlgmr.msrb.gmra.mxu0 %v528_v21 }
 0x30c   :  { %v606_v28 = vpop.f32.mrf.mxu0 }
 0x30d   :  { %v607_v29 = vadd.f32 %v1137_v26, %v606_v28 }
 0x30f   :  { %v1000_v31 = vmul.f32 -1.442695, %v607_v29 }
 0x311   :  { %1146 = vpow2.f32 %v1000_v31 }
 0x314   :  { %v608_v32 = vpop.f32.mrf.mxu0 }
 0x315   :  { %v609_v33 = vadd.f32 %v1137_v26, %v608_v32 }
 0x317   :  { %v1147_v35 = vpop.eup %1146  ;;  %v1001_v36 = vmul.f32 -1.442695, %v609_v33 }
 0x318   :  { %v617_v38 = vadd.f32 1.0, %v1147_v35 }
 0x319   :  { %1148 = vpow2.f32 %v1001_v36 }
 0x31a   :  { %1150 = vrcp.f32 %v617_v38  ;;  %vm624_vm9 = vweird.f32 %v617_v38  ;;  %v630_v52 = vand.u32 2147483648, %v617_v38  ;;  %v628_v54 = vand.u32 2147483647, %v617_v38 }
 0x31c   :  { %v631_v59 = vor.u32 1.1754944e-38, %v630_v52  ;;  %vm629_vm14 = vcmp.eq.f32.partialorder %v628_v54, 8.507059e+37 }
 0x31f   :  { %v1149_v40 = vpop.eup %1148 }
 0x320   :  { %v1151_v42 = vpop.eup %1150  ;;  %v618_v43 = vadd.f32 1.0, %v1149_v40 }
 0x321   :  { %v620_v44 = vmul.f32 %v1151_v42, %v617_v38  ;;  %vm625_vm8 = vweird.f32 %v1151_v42 }
 0x322   :  { %1152 = vrcp.f32 %v618_v43  ;;  %v645_v53 = vand.u32 2147483648, %v618_v43  ;;  %v643_v56 = vand.u32 2147483647, %v618_v43  ;;  %vm626_vm11 = vmor %vm624_vm9, %vm625_vm8  ;;  %vm639_vm12 = vweird.f32 %v618_v43 }
 0x323   :  { %v621_v45 = vsub.f32 1.0, %v620_v44 }
 0x324   :  { %v646_v60 = vor.u32 1.1754944e-38, %v645_v53  ;;  %vm644_vm15 = vcmp.eq.f32.partialorder %v643_v56, 8.507059e+37 }
 0x325   :  { %v622_v47 = vmul.f32 %v1151_v42, %v621_v45 }
 0x327   :  { %v623_v50 = vadd.f32 %v1151_v42, %v622_v47 }
 0x328   :  { %v1153_v48 = vpop.eup %1152 }
 0x329   :  { %v635_v49 = vmul.f32 %v1153_v48, %v618_v43  ;;  %vm640_vm10 = vweird.f32 %v1153_v48  ;;  %v627_v57 = vsel %vm626_vm11, %v1151_v42, %v623_v50 }
 0x32a   :  { %vm641_vm13 = vmor %vm639_vm12, %vm640_vm10  ;;  %v632_v62 = vsel %vm629_vm14, %v631_v59, %v627_v57 }
 0x32b   :  { %v636_v51 = vsub.f32 1.0, %v635_v49 }
 0x32d   :  { %v637_v55 = vmul.f32 %v1153_v48, %v636_v51 }
 0x32f   :  { %v638_v58 = vadd.f32 %v1153_v48, %v637_v55 }
 0x331   :  { %v642_v61 = vsel %vm641_vm13, %v1153_v48, %v638_v58 }
 0x332   :  { %v647_v63 = vsel %vm644_vm15, %v646_v60, %v642_v61 }
 0x333   :  { %v649_v0 = vpack.c.bf16 %v647_v63, %v632_v62 }
 0x335   :  { %722 = vmatmul.bf16.vlgmr.msrb.gmra.mxu1 %v649_v0 }
 0x3b2   :  { %v723_v4 = vpop.f32.mrf.mxu1 }
 0x3b3   :  { %v728_v6 = vmul.f32 %v723_v4, %v1509_v19 }
 0x3ba   :  { %v725_v5 = vpop.f32.mrf.mxu1 }
 0x3bb   :  { %v729_v7 = vmul.f32 %v725_v5, %v1511_v20 }
 0x3bd   :  { %v730_v8 = vpack.c.bf16 %v729_v7, %v728_v6 }
 0x3bf   :  { %803 = vmatmul.bf16.vlgmr.msrb.gmra.mxu2 %v730_v8 }
 0x442   :  { %v804_v9 = vpop.f32.mrf.mxu2 }
 0x443   :  { %809 = vst [vmem:[#allocation16] sm:$0xff] %v804_v9 }
 0x44a   :  { %v806_v10 = vpop.f32.mrf.mxu2 }
 0x44b   :  { %810 = vst [vmem:[#allocation16 + $0x8] sm:$0xff] %v806_v10 }
 0x44c   :  { %823 = dma.vmem_to_hbm [thread:$0]  %s816_s28, 256, %s818_s11, [#allocation4], %s1393_s6, %s1393_s6, %s1394_s12  }
 0x44d   :  { %1380 = dma.done.wait [#allocation4], 256  }
 0x44e   :  { %1381 = vsyncadd [#allocation4], 4294967040 }
 0x44f   :  { %828 = vsyncpa [#allocation3], 1 }
 0x450   :  { %829 = vsyncpa [#allocation6], 1 }
 0x451   :  { %830 = vsyncpa [#allocation9], 1 }
 0x452   :  { %831 = vsyncpa [#allocation12], 1 }
 0x453   :  { %832 = vsyncpa [#allocation15], 1 }
 0x454   :  { %833 = vsyncpa [#allocation4], 1 }

</bundles_post_ra>
